<compile_context>
chip_gen: v7x
topology: tpu7x:2x2x1
jax: 0.10.0
libtpu: 0.0.40
codegen_flags: <defaults>
</compile_context>

<pallas_src>
from typing import NamedTuple, Optional

import jax
import jax.numpy as jnp
from jax.experimental import pallas as pl
from jax.experimental.pallas import tpu as pltpu

EPS = 1e-12           # matches torch.nn.functional.normalize default eps
_EPS2 = EPS * EPS     # max(ss, eps^2) == (max(||.||, eps))^2 exactly (sqrt monotone)


def _round_up(a, b):
    return (a + b - 1) // b * b


# --------------------------------------------------------------------------- #
# Kernel
# --------------------------------------------------------------------------- #
def _normalized_linear_kernel(x_ref, w_ref, xss_ref, wss_ref, o_ref, acc_ref):
    k = pl.program_id(2)

    @pl.when(k == 0)
    def _init():
        acc_ref[...] = jnp.zeros_like(acc_ref)

    # x @ W.T as a last-dim/last-dim dot_general: native-dtype operands go
    # straight to the MXU, f32 accumulate, no transposed weight copy.
    acc_ref[...] += jax.lax.dot_general(
        x_ref[...], w_ref[...], (((1,), (1,)), ((), ())),
        preferred_element_type=jnp.float32)

    @pl.when(k == pl.num_programs(2) - 1)
    def _finalize():
        eps2 = jnp.float32(_EPS2)
        inv_x = jax.lax.rsqrt(jnp.maximum(xss_ref[...], eps2))   # (tm, 1)  EUP
        inv_w = jax.lax.rsqrt(jnp.maximum(wss_ref[...], eps2))   # (1, tn)  EUP
        o_ref[...] = (acc_ref[...] * inv_x * inv_w).astype(o_ref.dtype)


# --------------------------------------------------------------------------- #
# Tiling / weight preparation
# --------------------------------------------------------------------------- #
def _default_tiles(B, N, K, in_itemsize):
    # Sublane pack for the dtype actually entering the kernel.
    pack = {4: 8, 2: 16, 1: 32}.get(in_itemsize, 8)
    tm = min(_round_up(B, pack), 512)
    Np = _round_up(N, 128)
    tn = min(Np, 512)
    # v7x megacore heuristic: keep >= 2 parallel (i, j) grid steps when the
    # problem is big enough to split, so both TensorCores get work.
    if (_round_up(B, tm) // tm) == 1 and (Np // tn) == 1 and Np >= 256:
        tn = _round_up(Np // 2, 128)
    # Deep K tile: fewer per-step overheads / fewer accumulator round-trips.
    # (On v6e/v7x prefer 256-multiples for tn/tk when overriding; 128 suffices
    # on v5e.  The caps below keep the double-buffered working set ~11-12 MiB.)
    tk_cap = 1024 if in_itemsize >= 4 else 2048
    tk = min(_round_up(K, 128), tk_cap)
    return tm, tn, tk


class PreparedWeight(NamedTuple):
    wp: jax.Array          # (Np, Kp) zero-padded weight, possibly cast
    wss: jax.Array         # (1, Np) f32 per-row sum of squares (padded rows = 0)
    out_features: int
    in_features: int
    tn: int
    tk: int


def prepare_weight(weight, *, tn, tk, compute_dtype=None) -> PreparedWeight:
    """Pad the weight to the kernel tiling and precompute row ||w||^2 once.

    Call this at parameter-load time and cache the result so the per-call
    wrapper never re-pads or re-reads the weight from HBM.
    """
    assert tn % 128 == 0 and tk % 128 == 0, (tn, tk)
    N, K = weight.shape
    Np, Kp = _round_up(N, tn), _round_up(K, tk)
    wss = jnp.sum(jnp.square(weight.astype(jnp.float32)), axis=1)[None, :]
    if Np != N:
        wss = jnp.pad(wss, ((0, 0), (0, Np - N)))
    wp = weight
    if compute_dtype is not None and jnp.dtype(compute_dtype) != weight.dtype:
        wp = wp.astype(compute_dtype)
    if (Np, Kp) != (N, K):
        wp = jnp.pad(wp, ((0, Np - N), (0, Kp - K)))
    return PreparedWeight(wp=wp, wss=wss, out_features=N, in_features=K,
                          tn=tn, tk=tk)


# --------------------------------------------------------------------------- #
# Wrapper
# --------------------------------------------------------------------------- #
def normalized_linear(x, weight=None, *, prepared: Optional[PreparedWeight] = None,
                      tm=None, tn=None, tk=None, compute_dtype=None, w_buffers=2):
    """x: (B, in_features); weight: (out_features, in_features) -> (B, out_features).

    Either pass `weight` (padded/normalized stats computed per call) or a
    `prepared` PreparedWeight (hoisted to parameter-load time).
    """
    B, K = x.shape
    out_dtype = x.dtype

    if prepared is None:
        assert weight is not None, "need `weight` or `prepared`"
        N, Kw = weight.shape
        assert Kw == K, (K, Kw)
        in_dtype = jnp.dtype(compute_dtype) if compute_dtype is not None else x.dtype
        dtm, dtn, dtk = _default_tiles(B, N, K, jnp.dtype(in_dtype).itemsize)
        tm = tm or dtm
        tn = tn or dtn
        tk = tk or dtk
        prepared = prepare_weight(weight, tn=tn, tk=tk, compute_dtype=compute_dtype)
    else:
        tn, tk = prepared.tn, prepared.tk
        assert prepared.in_features == K, (prepared.in_features, K)
        if compute_dtype is None and prepared.wp.dtype != x.dtype:
            compute_dtype = prepared.wp.dtype   # keep MXU operand dtypes matched
        in_dtype = jnp.dtype(compute_dtype) if compute_dtype is not None else x.dtype
        if tm is None:
            tm, _, _ = _default_tiles(B, prepared.out_features, K,
                                      jnp.dtype(in_dtype).itemsize)

    assert tm % 8 == 0 and tn % 128 == 0 and tk % 128 == 0, (tm, tn, tk)

    N = prepared.out_features
    wp, wss = prepared.wp, prepared.wss
    Np, Kp = wp.shape
    Bp = _round_up(B, tm)

    # Per-row ||x||^2 precomputed in f32 (kernel only does matmul + rescale).
    xss = jnp.sum(jnp.square(x.astype(jnp.float32)), axis=1, keepdims=True)
    if Bp != B:
        xss = jnp.pad(xss, ((0, Bp - B), (0, 0)))

    x_in = x
    if compute_dtype is not None and jnp.dtype(compute_dtype) != x.dtype:
        x_in = x_in.astype(compute_dtype)
    if (Bp, Kp) != (B, K):
        x_in = jnp.pad(x_in, ((0, Bp - B), (0, Kp - K)))
    # Zero padding is exact: padded rows/cols give zero accumulators and a
    # finite rsqrt(eps^2) scale -> zeros, sliced off below.

    in_itemsize = jnp.dtype(in_dtype).itemsize
    out_itemsize = jnp.dtype(out_dtype).itemsize

    # Scoped-VMEM bookkeeping: double-buffered x/W/out blocks + f32 accumulator.
    w_depth = max(2, int(w_buffers))
    est_vmem = (2 * tm * tk * in_itemsize + w_depth * tn * tk * in_itemsize
                + 2 * tm * tn * out_itemsize + tm * tn * 4 + 2 * (tm + tn) * 4)
    vmem_limit = None
    if est_vmem > 14 * 1024 * 1024:
        # Above v5e's 16 MiB default scoped VMEM; bump, but stay well under
        # v7x's 64 MiB physical VMEM per TensorCore.
        vmem_limit = min(int(est_vmem * 5 // 4), 48 * 1024 * 1024)

    if w_buffers > 2:
        w_spec = pl.BlockSpec((tn, tk), lambda i, j, k: (j, k),
                              pipeline_mode=pl.Buffered(w_buffers))
    else:
        w_spec = pl.BlockSpec((tn, tk), lambda i, j, k: (j, k))

    cost = pl.CostEstimate(
        flops=2 * B * N * K,
        bytes_accessed=(x_in.size * in_itemsize + wp.size * wp.dtype.itemsize
                        + xss.size * 4 + wss.size * 4 + Bp * Np * out_itemsize),
        transcendentals=Bp + Np)

    out = pl.pallas_call(
        _normalized_linear_kernel,
        out_shape=jax.ShapeDtypeStruct((Bp, Np), out_dtype),
        grid_spec=pltpu.PrefetchScalarGridSpec(
            num_scalar_prefetch=0,
            grid=(Bp // tm, Np // tn, Kp // tk),
            in_specs=[
                pl.BlockSpec((tm, tk), lambda i, j, k: (i, k)),   # x tile
                w_spec,                                           # W tile
                pl.BlockSpec((tm, 1), lambda i, j, k: (i, 0)),    # ||x||^2
                pl.BlockSpec((1, tn), lambda i, j, k: (0, j)),    # ||w||^2
            ],
            out_specs=pl.BlockSpec((tm, tn), lambda i, j, k: (i, j)),
            scratch_shapes=[pltpu.VMEM((tm, tn), jnp.float32)],   # f32 accumulator
        ),
        compiler_params=pltpu.CompilerParams(
            # M, N parallel (shards across v7x's 2 TensorCores; no-op on
            # v5e/v6e); K must be "arbitrary" because of the accumulator.
            dimension_semantics=("parallel", "parallel", "arbitrary"),
            vmem_limit_bytes=vmem_limit),
        cost_estimate=cost,
    )(x_in, wp, xss, wss)
    return out[:B, :N]


# --------------------------------------------------------------------------- #
# Reference / init / test
# --------------------------------------------------------------------------- #
def _reference(x, weight):
    x_n = x / jnp.maximum(jnp.linalg.norm(x, axis=1, keepdims=True), EPS)
    w_n = weight / jnp.maximum(jnp.linalg.norm(weight, axis=1, keepdims=True), EPS)
    return jnp.matmul(x_n, w_n.T, precision=jax.lax.Precision.HIGHEST)


def xavier_uniform(key, out_features, in_features, dtype=jnp.float32):
    # nn.init.xavier_uniform_: U(-a, a), a = sqrt(6 / (fan_in + fan_out))
    bound = (6.0 / (in_features + out_features)) ** 0.5
    return jax.random.uniform(key, (out_features, in_features), dtype=dtype,
                              minval=-bound, maxval=bound)


if __name__ == "__main__":
    key = jax.random.PRNGKey(0)
    k1, k2, k3, k4 = jax.random.split(key, 4)

    # Tolerance accommodates MXU rounding of f32 operands; the normalization
    # algebra itself is exact.
    ATOL = RTOL = 5e-3

    # Case 1: the module's toy shape (single grid step, lane-dense padded out).
    B, Cin, Cout = 8, 32, 16
    x = jax.random.normal(k1, (B, Cin), dtype=jnp.float32)
    w = xavier_uniform(k2, Cout, Cin)
    out = normalized_linear(x, w)
    jax.block_until_ready(out)
    assert out.shape == (B, Cout)
    assert jnp.allclose(out, _reference(x, w), atol=ATOL, rtol=RTOL)

    # Case 2: multi-step grid (K accumulation, N tiling, padding), with the
    # weight prepared ONCE (padding + ||w||^2 hoisted out of the call path).
    B2, Cin2, Cout2 = 16, 384, 300
    x2 = jax.random.normal(k3, (B2, Cin2), dtype=jnp.float32)
    w2 = xavier_uniform(k4, Cout2, Cin2)
    prep = prepare_weight(w2, tn=128, tk=128)          # small tiles -> 1x3x3 grid
    out2 = normalized_linear(x2, prepared=prep)
    jax.block_until_ready(out2)
    assert out2.shape == (B2, Cout2)
    assert jnp.allclose(out2, _reference(x2, w2), atol=ATOL, rtol=RTOL)

    # Case 3: bf16 MXU path (operands cast before the call, f32 stats/acc) and
    # the megacore tn-split heuristic (grid_j == 2).
    out3 = normalized_linear(x2, w2, compute_dtype=jnp.bfloat16)
    jax.block_until_ready(out3)
    assert out3.shape == (B2, Cout2)
    assert jnp.allclose(out3, _reference(x2, w2), atol=2e-2, rtol=2e-2)

    print("KERNEL_OK")
</pallas_src>

<mosaic_0001>
module attributes {stable_mosaic.version = 11 : i64} {
  func.func @_normalized_linear_kernel(%arg0: i32, %arg1: i32, %arg2: i32, %arg3: memref<8x128xf32, #tpu.memory_space<vmem>>, %arg4: memref<128x128xf32, #tpu.memory_space<vmem>>, %arg5: memref<8x1xf32, #tpu.memory_space<vmem>>, %arg6: memref<1x128xf32, #tpu.memory_space<vmem>>, %arg7: memref<8x128xf32, #tpu.memory_space<vmem>>, %arg8: memref<8x128xf32, #tpu.memory_space<vmem>>) attributes {dimension_semantics = [#tpu.dimension_semantics<parallel>, #tpu.dimension_semantics<parallel>, #tpu.dimension_semantics<arbitrary>], iteration_bounds = array<i64: 1, 1, 1>, scalar_prefetch = 0 : i64, scratch_operands = 1 : i64, tpu.core_type = #tpu.core_type<tc>, window_params = [{transform_indices = @transform_0, window_bounds = array<i64: 8, 128>}, {transform_indices = @transform_1, window_bounds = array<i64: 128, 128>}, {transform_indices = @transform_2, window_bounds = array<i64: 8, 1>}, {transform_indices = @transform_3, window_bounds = array<i64: 1, 128>}, {transform_indices = @transform_4, window_bounds = array<i64: 8, 128>}]} {
    %c0_i32 = arith.constant 0 : i32
    %0 = arith.cmpi eq, %arg2, %c0_i32 : i32
    %1 = arith.extui %0 : i1 to i32
    %c0_i32_0 = arith.constant 0 : i32
    %2 = arith.cmpi ne, %1, %c0_i32_0 : i32
    scf.if %2 {
      %cst_10 = arith.constant 0.000000e+00 : f32
      %12 = vector.broadcast %cst_10 : f32 to vector<8x128xf32>
      %c0_11 = arith.constant 0 : index
      %c0_12 = arith.constant 0 : index
      %13 = vector.load %arg8[%c0_11, %c0_12] : memref<8x128xf32, #tpu.memory_space<vmem>>, vector<8x128xf32>
      tpu.vector_store %arg8[%c0_11, %c0_12], %12 {strides = array<i32>} : memref<8x128xf32, #tpu.memory_space<vmem>>, vector<8x128xf32>,
    } else {
    }
    %c0 = arith.constant 0 : index
    %c0_1 = arith.constant 0 : index
    %3 = vector.load %arg8[%c0, %c0_1] : memref<8x128xf32, #tpu.memory_space<vmem>>, vector<8x128xf32>
    %c0_2 = arith.constant 0 : index
    %c0_3 = arith.constant 0 : index
    %4 = vector.load %arg3[%c0_2, %c0_3] : memref<8x128xf32, #tpu.memory_space<vmem>>, vector<8x128xf32>
    %c0_4 = arith.constant 0 : index
    %c0_5 = arith.constant 0 : index
    %5 = vector.load %arg4[%c0_4, %c0_5] : memref<128x128xf32, #tpu.memory_space<vmem>>, vector<128x128xf32>
    %cst = arith.constant dense<0.000000e+00> : vector<8x128xf32>
    %6 = tpu.matmul %4, %5, %cst {dimension_numbers = #tpu.dot_dimension_numbers<[1], [1], [0], [0], [0, 0, 1, 0], [], []>} : vector<8x128xf32>, vector<128x128xf32>, vector<8x128xf32> -> vector<8x128xf32>
    %7 = arith.addf %3, %6 : vector<8x128xf32>
    %c0_6 = arith.constant 0 : index
    %c0_7 = arith.constant 0 : index
    %8 = vector.load %arg8[%c0_6, %c0_7] : memref<8x128xf32, #tpu.memory_space<vmem>>, vector<8x128xf32>
    tpu.vector_store %arg8[%c0_6, %c0_7], %7 {strides = array<i32>} : memref<8x128xf32, #tpu.memory_space<vmem>>, vector<8x128xf32>,
    %c0_i32_8 = arith.constant 0 : i32
    %9 = arith.cmpi eq, %arg2, %c0_i32_8 : i32
    %10 = arith.extui %9 : i1 to i32
    %c0_i32_9 = arith.constant 0 : i32
    %11 = arith.cmpi ne, %10, %c0_i32_9 : i32
    scf.if %11 {
      %c0_10 = arith.constant 0 : index
      %c0_11 = arith.constant 0 : index
      %12 = vector.load %arg5[%c0_10, %c0_11] : memref<8x1xf32, #tpu.memory_space<vmem>>, vector<8x1xf32>
      %cst_12 = arith.constant 1.000000e-24 : f32
      %13 = vector.broadcast %cst_12 : f32 to vector<8x1xf32>
      %14 = arith.maximumf %12, %13 : vector<8x1xf32>
      %15 = math.rsqrt %14 : vector<8x1xf32>
      %c0_13 = arith.constant 0 : index
      %c0_14 = arith.constant 0 : index
      %16 = vector.load %arg6[%c0_13, %c0_14] : memref<1x128xf32, #tpu.memory_space<vmem>>, vector<1x128xf32>
      %cst_15 = arith.constant 1.000000e-24 : f32
      %17 = vector.broadcast %cst_15 : f32 to vector<1x128xf32>
      %18 = arith.maximumf %16, %17 : vector<1x128xf32>
      %19 = math.rsqrt %18 : vector<1x128xf32>
      %c0_16 = arith.constant 0 : index
      %c0_17 = arith.constant 0 : index
      %20 = vector.load %arg8[%c0_16, %c0_17] : memref<8x128xf32, #tpu.memory_space<vmem>>, vector<8x128xf32>
      %21 = vector.broadcast %15 : vector<8x1xf32> to vector<8x128xf32>
      %22 = arith.mulf %20, %21 : vector<8x128xf32>
      %23 = vector.broadcast %19 : vector<1x128xf32> to vector<8x128xf32>
      %24 = arith.mulf %22, %23 : vector<8x128xf32>
      %c0_18 = arith.constant 0 : index
      %c0_19 = arith.constant 0 : index
      %25 = vector.load %arg7[%c0_18, %c0_19] : memref<8x128xf32, #tpu.memory_space<vmem>>, vector<8x128xf32>
      tpu.vector_store %arg7[%c0_18, %c0_19], %24 {strides = array<i32>} : memref<8x128xf32, #tpu.memory_space<vmem>>, vector<8x128xf32>,
    } else {
    }
    return
  }
  func.func @transform_0(%arg0: i32, %arg1: i32, %arg2: i32) -> (i32, i32) {
    %c0_i32 = arith.constant 0 : i32
    return %arg0, %arg2 : i32, i32
  }
  func.func @transform_1(%arg0: i32, %arg1: i32, %arg2: i32) -> (i32, i32) {
    %c0_i32 = arith.constant 0 : i32
    return %arg1, %arg2 : i32, i32
  }
  func.func @transform_2(%arg0: i32, %arg1: i32, %arg2: i32) -> (i32, i32) {
    %c0_i32 = arith.constant 0 : i32
    %c0_i32_0 = arith.constant 0 : i32
    return %arg0, %c0_i32 : i32, i32
  }
  func.func @transform_3(%arg0: i32, %arg1: i32, %arg2: i32) -> (i32, i32) {
    %c0_i32 = arith.constant 0 : i32
    %c0_i32_0 = arith.constant 0 : i32
    return %c0_i32, %arg1 : i32, i32
  }
  func.func @transform_4(%arg0: i32, %arg1: i32, %arg2: i32) -> (i32, i32) {
    %c0_i32 = arith.constant 0 : i32
    return %arg0, %arg1 : i32, i32
  }
}

</mosaic_0001>

<bundles_post_ra>
// kernel: tpu_custom_call.1
= control target key start
LH: loop header
LB: loop body
LE: loop exit
PB: predicated region body
PF: predicated region fallthrough
CT: control target
= control target key end

     0   :  { %9 = vsyncpa [#allocation4], 0  ;;  %s369_s0 = inlined_call_operand.vmem [shape: f32[8,128], index: 0, kind: input, shape index: {}]   ;;  %s370_s1 = inlined_call_operand.hbm [shape: f32[128,128], index: 1, kind: input, shape index: {}]   ;;  %s371_s2 = inlined_call_operand.vmem [shape: f32[8,1], index: 2, kind: input, shape index: {}]   ;;  %s372_s3 = inlined_call_operand.vmem [shape: f32[1,128], index: 3, kind: input, shape index: {}]   ;;  %s373_s4 = inlined_call_operand.hbm [shape: f32[8,128], index: 4, kind: output, shape index: {}]  }
   0x1   :  { %10 = vsyncpa [#allocation5], 0  ;;  %s303_s15 = smov [#allocation3]   ;;  %s255_s19 = scalar_lea.hbm %s370_s1, 2048 }
   0x2   :  { %s18_s16 = sshll.u32 %s303_s15, 4  ;;  %p256_p0 = scmp.ne.s32.totalorder %s370_s1, %s255_s19  ;;  %s19_s16 = int_to_ptr.vmem [resolvable:$true] %s18_s16 }
   0x3   :  { %p259_p1 = scmp.lt.u32.totalorder %s255_s19, %s370_s1 }
   0x5   :  { %p261_p2 = pnand %p259_p1, %p256_p0 }
   0x7   :  { %264 = shalt.err (!%p261_p2)
}
   0x8   :  { %s265_s24 = scalar_lea.vmem %s19_s16, 2048  ;;  %p270_p4 = scmp.lt.s32.totalorder %s19_s16, %s19_s16 }
   0x9   :  { %p266_p3 = scmp.ne.s32.totalorder %s19_s16, %s265_s24  ;;  %p271_p5 = scmp.lt.s32.totalorder %s265_s24, %s265_s24 }
   0xb   :  { %p272_p6 = por %p271_p5, %p270_p4 }
   0xd   :  { %p273_p7 = pnand %p272_p6, %p266_p3 }
   0xf   :  { %276 = shalt.err (!%p273_p7)
}
  0x10   :  { %s304_s25 = smov 128   ;;  %s305_s26 = smov 8  }
  0x11   :  { %24 = dma.hbm_to_vmem [thread:$0]  %s370_s1, 2048, %s19_s16, [#allocation4], %s304_s25, %s304_s25, %s305_s26  }
  0x12   :  { %299 = dma.done.wait [#allocation4], 2048  }
  0x13   :  { %300 = vsyncadd [#allocation4], 4294965248  ;;  %v306_v0 = vmov 0.0|0.0   ;;  %vm307_vm0 = vmmov 0   ;;  %v308_v1 = vmov 0.0   ;;  %v309_v2 = vmov 0  }
  0x14   :  { %218 = vmatprep.subr.bf16.mxu0 %v306_v0  ;;  %215 = vmatprep.mubr.msk.f32.mxu0 %vm307_vm0, %v308_v1  ;;  %v39_v3 = vld [vmem:[#allocation3] sm:$0xff]  ;;  %v40_v4 = vld [vmem:[#allocation3 + $0x8] sm:$0xff]  ;;  %v41_v6 = vld [vmem:[#allocation3 + $0x10] sm:$0xff]  ;;  %v144_v33 = vlaneseq  ;;  %s310_s7 = smov [#allocation6]  }
  0x15   :  { %250 = vset.pattern.permute.xlu0 %v309_v2  ;;  %v219_v5 = vpack.c.bf16 %v40_v4, %v39_v3  ;;  %v42_v7 = vld [vmem:[#allocation3 + $0x18] sm:$0xff]  ;;  %v130_v8 = vld [vmem:[%s371_s2] sm:$0xff]  ;;  %v44_v12 = vld [vmem:[#allocation3 + $0x28] sm:$0xff]  ;;  %s157_s8 = sshll.u32 %s310_s7, 4  ;;  %s158_s8 = int_to_ptr.vmem [resolvable:$true] %s157_s8 }
  0x16   :  { %v131_v9 = vmax.f32 %v130_v8, 1e-24  ;;  %v222_v10 = vpack.c.bf16 %v42_v7, %v41_v6  ;;  %v43_v11 = vld [vmem:[#allocation3 + $0x20] sm:$0xff]  ;;  %v45_v15 = vld [vmem:[#allocation3 + $0x30] sm:$0xff]  ;;  %v46_v16 = vld [vmem:[#allocation3 + $0x38] sm:$0xff]  ;;  %v145_v34 = vshrl.u32 %v144_v33, 7  ;;  %p282_p9 = scmp.lt.s32.totalorder %s158_s8, %s158_s8 }
  0x17   :  { %220 = vmatpush3.bf16.xpose.msra.mxu0 %v219_v5  ;;  %v225_v13 = vpack.c.bf16 %v44_v12, %v43_v11  ;;  %v228_v17 = vpack.c.bf16 %v46_v16, %v45_v15  ;;  %v47_v18 = vld [vmem:[#allocation3 + $0x40] sm:$0xff]  ;;  %v48_v19 = vld [vmem:[#allocation3 + $0x48] sm:$0xff]  ;;  %v49_v21 = vld [vmem:[#allocation3 + $0x50] sm:$0xff] }
  0x18   :  { %221 = vmatprep.subr.bf16.mxu0 %v306_v0  ;;  %251 = vrsqrt.f32 %v131_v9  ;;  %v231_v20 = vpack.c.bf16 %v48_v19, %v47_v18  ;;  %v50_v22 = vld [vmem:[#allocation3 + $0x58] sm:$0xff]  ;;  %v51_v24 = vld [vmem:[#allocation3 + $0x60] sm:$0xff]  ;;  %v52_v25 = vld [vmem:[#allocation3 + $0x68] sm:$0xff]  ;;  %v146_v35 = vsub.s32 0, %v145_v34 }
  0x19   :  { %v234_v23 = vpack.c.bf16 %v50_v22, %v49_v21  ;;  %v237_v26 = vpack.c.bf16 %v52_v25, %v51_v24  ;;  %v53_v27 = vld [vmem:[#allocation3 + $0x70] sm:$0xff]  ;;  %v54_v28 = vld [vmem:[#allocation3 + $0x78] sm:$0xff]  ;;  %v38_v30 = vld [vmem:[%s369_s0] sm:$0xff]  ;;  %s277_s0 = scalar_lea.vmem %s158_s8, 128 }
  0x1a   :  { %v240_v29 = vpack.c.bf16 %v54_v28, %v53_v27  ;;  %v133_v31 = vld [vmem:[%s372_s3] sm:$0x1]  ;;  %p278_p8 = scmp.ne.s32.totalorder %s158_s8, %s277_s0  ;;  %p283_p10 = scmp.lt.s32.totalorder %s277_s0, %s277_s0 }
  0x1b   :  { %v134_v32 = vmax.f32 %v133_v31, 1e-24 }
  0x1c   :  { %p284_p11 = por %p283_p10, %p282_p9 }
  0x1d   :  { %253 = vrsqrt.f32 %v134_v32 }
  0x1e   :  { %p285_p12 = pnand %p284_p11, %p278_p8 }
  0x1f   :  { %223 = vmatpush3.bf16.xpose.msra.mxu0 %v222_v10 }
  0x20   :  { %224 = vmatprep.subr.bf16.mxu0 %v306_v0 }
  0x22   :  { %v252_v14 = vpop.eup %251 }
  0x23   :  { %139 = vperm.xlu0 %250, %v252_v14  }
  0x27   :  { %226 = vmatpush3.bf16.xpose.msra.mxu0 %v225_v13  ;;  %v254_v36 = vpop.eup %253 }
  0x28   :  { %227 = vmatprep.subr.bf16.mxu0 %v306_v0  ;;  %v147_v38 = vrot.slane %v254_v36, %v146_v35 }
  0x2f   :  { %229 = vmatpush3.bf16.xpose.msra.mxu0 %v228_v17 }
  0x30   :  { %230 = vmatprep.subr.bf16.mxu0 %v306_v0 }
  0x37   :  { %232 = vmatpush3.bf16.xpose.msra.mxu0 %v231_v20 }
  0x38   :  { %233 = vmatprep.subr.bf16.mxu0 %v306_v0 }
  0x3f   :  { %235 = vmatpush3.bf16.xpose.msra.mxu0 %v234_v23 }
  0x40   :  { %236 = vmatprep.subr.bf16.mxu0 %v306_v0 }
  0x47   :  { %238 = vmatpush3.bf16.xpose.msra.mxu0 %v237_v26 }
  0x48   :  { %239 = vmatprep.subr.bf16.mxu0 %v306_v0 }
  0x4f   :  { %241 = vmatpush3.bf16.xpose.msra.mxu0 %v240_v29 }
  0x56   :  { %216 = vmatmul.mubr.f32.vlgmr.msra.gmra.mrb[0].mxu0 %v38_v30 }
  0xa2   :  { %v140_v37 = vpop.permute.xlu0 %139 }
 0x129   :  { %v121_v39 = vpop.f32.mrb[0].mxu0 }
 0x12a   :  { %v142_v40 = vmul.f32 %v140_v37, %v121_v39  ;;  %v217_v41 = vpop.f32.mrb[1].mxu0 }
 0x12c   :  { %v149_v42 = vmul.f32 %v147_v38, %v142_v40 }
 0x12e   :  { %150 = vst [vmem:[#allocation6] sm:$0xff] %v149_v42 }
 0x12f   :  { %288 = shalt.err (!%p285_p12)
}
 0x130   :  { %s289_s10 = scalar_lea.hbm %s373_s4, 128 }
 0x131   :  { %p290_p13 = scmp.ne.s32.totalorder %s373_s4, %s289_s10  ;;  %p293_p0 = scmp.lt.u32.totalorder %s289_s10, %s373_s4 }
 0x133   :  { %p295_p1 = pnand %p293_p0, %p290_p13 }
 0x135   :  { %298 = shalt.err (!%p295_p1)
}
 0x136   :  { %160 = dma.vmem_to_hbm [thread:$0]  %s158_s8, 128, %s373_s4, [#allocation5]  }
 0x137   :  { %301 = dma.done.wait [#allocation5], 128  }
 0x138   :  { %302 = vsyncadd [#allocation5], 4294967168 }
 0x139   :  { %164 = vsyncpa [#allocation4], 1 }
 0x13a   :  { %165 = vsyncpa [#allocation5], 1 }

</bundles_post_ra>
